<compile_context>
chip_gen: v7x
topology: tpu7x:2x2x1
jax: 0.10.0
libtpu: 0.0.40
codegen_flags: <defaults>
</compile_context>

<pallas_src>
import functools

import jax
import jax.numpy as jnp
from jax.experimental import pallas as pl
from jax.experimental.pallas import tpu as pltpu


def _round_up(x, m):
    return ((x + m - 1) // m) * m


def mlp_kernel(x_ref, w1_ref, b1_ref, w2_ref, b2_ref, w3_ref, b3_ref, o_ref,
               *, act_dtype):
    # In-kernel bf16 cast of the x tile (VPU; avoids a separate wrapper pass).
    x = x_ref[...].astype(jnp.bfloat16)                              # (TB, Din)

    # fc1 + tanh: bf16 MXU operands, f32 accumulate; tanh in act_dtype
    # (bf16 on v6e/v7x EUP, f32 on v5e).
    h1 = jnp.dot(x, w1_ref[...], preferred_element_type=jnp.float32) + b1_ref[...]
    h1 = jnp.tanh(h1.astype(act_dtype))                              # (TB, H)

    # dropout (eval mode) -> identity

    # fc2 + tanh (h1 already bf16 when act_dtype is bf16; cast is a no-op then).
    h2 = jnp.dot(h1.astype(jnp.bfloat16), w2_ref[...],
                 preferred_element_type=jnp.float32) + b2_ref[...]
    h2 = jnp.tanh(h2.astype(act_dtype))                              # (TB, H)

    # dropout (eval mode) -> identity

    # fc3 + sigmoid as VPU multiply + lane (XLU) reduction -> lane-dense store.
    b3 = b3_ref[0, 0]                                                # SMEM scalar
    logits = jnp.sum(h2.astype(jnp.float32) * w3_ref[...], axis=-1) + b3  # (TB,)
    o_ref[...] = jax.nn.sigmoid(logits)[None, :]                     # (1, TB)


def simple_mlp_forward(x, params, *, tile_b=None):
    """x: (B, dim_in) float32; params stored in (in, out) layout (vs PyTorch (out, in))."""
    w1, b1, w2, b2, w3, b3 = (params["w1"], params["b1"], params["w2"],
                              params["b2"], params["w3"], params["b3"])
    B, dim_in = x.shape
    H = w1.shape[1]

    # Chip-generation dispatch (conservative: only v6/v7 get the bf16 EUP path).
    try:
        kind = jax.devices()[0].device_kind.lower()
    except Exception:  # pragma: no cover - keep the always-correct path
        kind = ""
    bf16_eup = ("v6" in kind) or ("v7" in kind)
    act_dtype = jnp.bfloat16 if bf16_eup else jnp.float32

    # Batch tile: large to amortize the ~0.35us/step grid overhead, multiple of
    # 128 so the (1, tile_b) output block is lane-dense; v5e gets a smaller tile
    # (16 MiB scoped-VMEM default, f32 activations).
    if tile_b is None:
        tile_b = 4096 if "v5" in kind else 8192
    tile_b = _round_up(min(tile_b, _round_up(B, 128)), 128)
    b_pad = _round_up(B, tile_b)
    num_tiles = b_pad // tile_b   # NOTE: >=2 tiles needed for 2-TC sharding on v7x.

    # Feed x in its native f32 layout (bf16 cast is done in-kernel); pad only
    # the ragged remainder when B is not a tile multiple.
    x_in = x if b_pad == B else jnp.pad(x, ((0, b_pad - B), (0, 0)))

    w1_bf = w1.astype(jnp.bfloat16)
    w2_bf = w2.astype(jnp.bfloat16)
    b1_f = b1.reshape(1, H).astype(jnp.float32)
    b2_f = b2.reshape(1, H).astype(jnp.float32)
    w3_row = w3.reshape(1, H).astype(jnp.float32)   # fc3 becomes a lane reduction
    b3_s = b3.reshape(1, 1).astype(jnp.float32)     # scalar -> SMEM

    # VMEM budget sized to the tile (double-buffered x/out + resident weights +
    # f32 activation temporaries + headroom), clamped per-generation.
    vmem_bytes = (2 * tile_b * dim_in * 4          # x blocks (f32, double-buffered)
                  + 2 * tile_b * 4                 # output blocks
                  + 2 * (dim_in * H + H * H) * 2   # bf16 weights
                  + 2 * 4 * H * 4                  # biases + w3 row
                  + 3 * tile_b * H * 4             # h1 / h2 / logits temporaries
                  + (8 << 20))                     # compiler scratch headroom
    vmem_cap = (48 << 20) if "v7" in kind else (100 << 20)
    vmem_limit = int(min(max(vmem_bytes, 32 << 20), vmem_cap))

    flops = 2 * b_pad * (dim_in * H + H * H + H)
    transcendentals = b_pad * (2 * H + 1)
    bytes_accessed = (b_pad * dim_in * 4 + b_pad * 4
                      + (dim_in * H + H * H) * 2
                      + (3 * H + 1) * 4)

    resident = lambda i: (0, 0)  # same block every step -> weights DMA'd once

    kernel = functools.partial(mlp_kernel, act_dtype=act_dtype)

    out = pl.pallas_call(
        kernel,
        out_shape=jax.ShapeDtypeStruct((1, b_pad), jnp.float32),
        grid=(num_tiles,),
        in_specs=[
            pl.BlockSpec((tile_b, dim_in), lambda i: (i, 0)),    # x batch tile (f32)
            pl.BlockSpec((dim_in, H), resident),                 # w1 (bf16)
            pl.BlockSpec((1, H), resident),                      # b1 (f32)
            pl.BlockSpec((H, H), resident),                      # w2 (bf16)
            pl.BlockSpec((1, H), resident),                      # b2 (f32)
            pl.BlockSpec((1, H), resident),                      # w3 row (f32)
            pl.BlockSpec(memory_space=pltpu.MemorySpace.SMEM),   # b3 scalar
        ],
        out_specs=pl.BlockSpec((1, tile_b), lambda i: (0, i)),   # lane-dense output
        compiler_params=pltpu.CompilerParams(
            dimension_semantics=("parallel",),                   # 2 TCs on v7x
            vmem_limit_bytes=vmem_limit,
        ),
        cost_estimate=pl.CostEstimate(
            flops=flops,
            transcendentals=transcendentals,
            bytes_accessed=bytes_accessed,
        ),
    )(x_in, w1_bf, b1_f, w2_bf, b2_f, w3_row, b3_s)

    return out[0, :B].reshape(B, 1)


def init_params(key, dim_in, dim_inner=128):
    """Deterministic synthetic init (PyTorch-Linear-like uniform fan-in scaling)."""
    ks = jax.random.split(key, 6)

    def lin(kw, kb, fan_in, fan_out):
        bound = 1.0 / jnp.sqrt(fan_in)
        w = jax.random.uniform(kw, (fan_in, fan_out), jnp.float32, -bound, bound)
        b = jax.random.uniform(kb, (1, fan_out), jnp.float32, -bound, bound)
        return w, b

    w1, b1 = lin(ks[0], ks[1], dim_in, dim_inner)
    w2, b2 = lin(ks[2], ks[3], dim_inner, dim_inner)
    w3, b3 = lin(ks[4], ks[5], dim_inner, 1)
    return {"w1": w1, "b1": b1, "w2": w2, "b2": b2, "w3": w3, "b3": b3}


if __name__ == "__main__":
    key = jax.random.PRNGKey(0)
    k_x, k_p = jax.random.split(key)

    batch, dim_in, dim_inner = 8, 16, 128
    x = jax.random.normal(k_x, (batch, dim_in), dtype=jnp.float32)
    params = init_params(k_p, dim_in, dim_inner)

    out = simple_mlp_forward(x, params)
    out = jax.block_until_ready(out)

    # Pure-JAX f32 reference (eval-mode dropout == identity).
    h1 = jnp.tanh(x @ params["w1"] + params["b1"])
    h2 = jnp.tanh(h1 @ params["w2"] + params["b2"])
    ref = jax.nn.sigmoid(h2 @ params["w3"] + params["b3"])

    assert out.shape == (batch, 1)
    # bf16 MXU operands (and bf16 tanh on v6e/v7x) -> loosened tolerance;
    # outputs are in [0, 1].
    assert jnp.allclose(out, ref, atol=2e-2, rtol=2e-2), float(
        jnp.max(jnp.abs(out - ref)))

    print("KERNEL_OK")
</pallas_src>

<mosaic_0001>
module attributes {stable_mosaic.version = 11 : i64} {
  func.func @mlp_kernel(%arg0: i32, %arg1: memref<128x16xf32, #tpu.memory_space<vmem>>, %arg2: memref<16x128xbf16, #tpu.memory_space<vmem>>, %arg3: memref<1x128xf32, #tpu.memory_space<vmem>>, %arg4: memref<128x128xbf16, #tpu.memory_space<vmem>>, %arg5: memref<1x128xf32, #tpu.memory_space<vmem>>, %arg6: memref<1x128xf32, #tpu.memory_space<vmem>>, %arg7: memref<1x1xf32, #tpu.memory_space<smem>>, %arg8: memref<1x128xf32, #tpu.memory_space<vmem>>) attributes {dimension_semantics = [#tpu.dimension_semantics<parallel>], iteration_bounds = array<i64: 1>, scalar_prefetch = 0 : i64, scratch_operands = 0 : i64, tpu.core_type = #tpu.core_type<tc>, window_params = [{transform_indices = @transform_0, window_bounds = array<i64: 128, 16>}, {pipeline_mode = #tpu.pipeline_mode<synchronous>, transform_indices = @transform_1, window_bounds = array<i64: 16, 128>}, {pipeline_mode = #tpu.pipeline_mode<synchronous>, transform_indices = @transform_2, window_bounds = array<i64: 1, 128>}, {pipeline_mode = #tpu.pipeline_mode<synchronous>, transform_indices = @transform_3, window_bounds = array<i64: 128, 128>}, {pipeline_mode = #tpu.pipeline_mode<synchronous>, transform_indices = @transform_4, window_bounds = array<i64: 1, 128>}, {pipeline_mode = #tpu.pipeline_mode<synchronous>, transform_indices = @transform_5, window_bounds = array<i64: 1, 128>}, {transform_indices = @transform_6, window_bounds = array<i64: 1, 1>}, {transform_indices = @transform_7, window_bounds = array<i64: 1, 128>}]} {
    %c0 = arith.constant 0 : index
    %c0_0 = arith.constant 0 : index
    %0 = vector.load %arg1[%c0, %c0_0] : memref<128x16xf32, #tpu.memory_space<vmem>>, vector<128x16xf32>
    %1 = arith.truncf %0 : vector<128x16xf32> to vector<128x16xbf16>
    %c0_1 = arith.constant 0 : index
    %c0_2 = arith.constant 0 : index
    %2 = vector.load %arg2[%c0_1, %c0_2] : memref<16x128xbf16, #tpu.memory_space<vmem>>, vector<16x128xbf16>
    %cst = arith.constant dense<0.000000e+00> : vector<128x128xf32>
    %3 = tpu.matmul %1, %2, %cst {dimension_numbers = #tpu.dot_dimension_numbers<[1], [0], [0], [1], [0, 0, 1, 1], [], []>} : vector<128x16xbf16>, vector<16x128xbf16>, vector<128x128xf32> -> vector<128x128xf32>
    %c0_3 = arith.constant 0 : index
    %c0_4 = arith.constant 0 : index
    %4 = vector.load %arg3[%c0_3, %c0_4] : memref<1x128xf32, #tpu.memory_space<vmem>>, vector<1x128xf32>
    %5 = vector.broadcast %4 : vector<1x128xf32> to vector<128x128xf32>
    %6 = arith.addf %3, %5 : vector<128x128xf32>
    %7 = math.tanh %6 : vector<128x128xf32>
    %8 = arith.truncf %7 : vector<128x128xf32> to vector<128x128xbf16>
    %c0_5 = arith.constant 0 : index
    %c0_6 = arith.constant 0 : index
    %9 = vector.load %arg4[%c0_5, %c0_6] : memref<128x128xbf16, #tpu.memory_space<vmem>>, vector<128x128xbf16>
    %cst_7 = arith.constant dense<0.000000e+00> : vector<128x128xf32>
    %10 = tpu.matmul %8, %9, %cst_7 {dimension_numbers = #tpu.dot_dimension_numbers<[1], [0], [0], [1], [0, 0, 1, 1], [], []>} : vector<128x128xbf16>, vector<128x128xbf16>, vector<128x128xf32> -> vector<128x128xf32>
    %c0_8 = arith.constant 0 : index
    %c0_9 = arith.constant 0 : index
    %11 = vector.load %arg5[%c0_8, %c0_9] : memref<1x128xf32, #tpu.memory_space<vmem>>, vector<1x128xf32>
    %12 = vector.broadcast %11 : vector<1x128xf32> to vector<128x128xf32>
    %13 = arith.addf %10, %12 : vector<128x128xf32>
    %14 = math.tanh %13 : vector<128x128xf32>
    %c0_10 = arith.constant 0 : index
    %c0_11 = arith.constant 0 : index
    %15 = memref.load %arg7[%c0_10, %c0_11] : memref<1x1xf32, #tpu.memory_space<smem>>
    %c0_12 = arith.constant 0 : index
    %c0_13 = arith.constant 0 : index
    %16 = vector.load %arg6[%c0_12, %c0_13] : memref<1x128xf32, #tpu.memory_space<vmem>>, vector<1x128xf32>
    %17 = vector.broadcast %16 : vector<1x128xf32> to vector<128x128xf32>
    %18 = arith.mulf %14, %17 : vector<128x128xf32>
    %cst_14 = arith.constant dense<0.000000e+00> : vector<128xf32>
    %19 = vector.multi_reduction <add>, %18, %cst_14 [1] : vector<128x128xf32> to vector<128xf32>
    %20 = vector.broadcast %15 : f32 to vector<128xf32>
    %21 = arith.addf %19, %20 : vector<128xf32>
    %22 = arith.negf %21 : vector<128xf32>
    %23 = math.exp %22 : vector<128xf32>
    %cst_15 = arith.constant 1.000000e+00 : f32
    %24 = vector.broadcast %cst_15 : f32 to vector<128xf32>
    %25 = arith.addf %24, %23 : vector<128xf32>
    %26 = arith.divf %24, %25 : vector<128xf32>
    %27 = vector.shape_cast %26 : vector<128xf32> to vector<1x128xf32>
    %c0_16 = arith.constant 0 : index
    %c0_17 = arith.constant 0 : index
    %28 = vector.load %arg8[%c0_16, %c0_17] : memref<1x128xf32, #tpu.memory_space<vmem>>, vector<1x128xf32>
    tpu.vector_store %arg8[%c0_16, %c0_17], %27 {strides = array<i32>} : memref<1x128xf32, #tpu.memory_space<vmem>>, vector<1x128xf32>,
    return
  }
  func.func @transform_0(%arg0: i32) -> (i32, i32) {
    %c0_i32 = arith.constant 0 : i32
    %c0_i32_0 = arith.constant 0 : i32
    return %arg0, %c0_i32 : i32, i32
  }
  func.func @transform_1(%arg0: i32) -> (i32, i32) {
    %c0_i32 = arith.constant 0 : i32
    %c0_i32_0 = arith.constant 0 : i32
    %c0_i32_1 = arith.constant 0 : i32
    return %c0_i32, %c0_i32_0 : i32, i32
  }
  func.func @transform_2(%arg0: i32) -> (i32, i32) {
    %c0_i32 = arith.constant 0 : i32
    %c0_i32_0 = arith.constant 0 : i32
    %c0_i32_1 = arith.constant 0 : i32
    return %c0_i32, %c0_i32_0 : i32, i32
  }
  func.func @transform_3(%arg0: i32) -> (i32, i32) {
    %c0_i32 = arith.constant 0 : i32
    %c0_i32_0 = arith.constant 0 : i32
    %c0_i32_1 = arith.constant 0 : i32
    return %c0_i32, %c0_i32_0 : i32, i32
  }
  func.func @transform_4(%arg0: i32) -> (i32, i32) {
    %c0_i32 = arith.constant 0 : i32
    %c0_i32_0 = arith.constant 0 : i32
    %c0_i32_1 = arith.constant 0 : i32
    return %c0_i32, %c0_i32_0 : i32, i32
  }
  func.func @transform_5(%arg0: i32) -> (i32, i32) {
    %c0_i32 = arith.constant 0 : i32
    %c0_i32_0 = arith.constant 0 : i32
    %c0_i32_1 = arith.constant 0 : i32
    return %c0_i32, %c0_i32_0 : i32, i32
  }
  func.func @transform_6(%arg0: i32) -> (i32, i32) {
    %c0_i32 = arith.constant 0 : i32
    %c0_i32_0 = arith.constant 0 : i32
    %c0_i32_1 = arith.constant 0 : i32
    return %c0_i32, %c0_i32_0 : i32, i32
  }
  func.func @transform_7(%arg0: i32) -> (i32, i32) {
    %c0_i32 = arith.constant 0 : i32
    %c0_i32_0 = arith.constant 0 : i32
    return %c0_i32, %arg0 : i32, i32
  }
}

</mosaic_0001>

<bundles_post_ra>
// kernel: tpu_custom_call.1
= control target key start
LH: loop header
LB: loop body
LE: loop exit
PB: predicated region body
PF: predicated region fallthrough
CT: control target
= control target key end

     0   :  { %vm68_vm0 = vcmask 130048   ;;  %s1242_s0 = inlined_call_operand.vmem [shape: f32[128,16], index: 0, kind: input, shape index: {}]   ;;  %s1243_s1 = inlined_call_operand.vmem [shape: bf16[16,128], index: 1, kind: input, shape index: {}]   ;;  %s1244_s2 = inlined_call_operand.vmem [shape: f32[1,128], index: 2, kind: input, shape index: {}]   ;;  %s1245_s3 = inlined_call_operand.vmem [shape: bf16[128,128], index: 3, kind: input, shape index: {}]   ;;  %s1246_s4 = inlined_call_operand.vmem [shape: f32[1,128], index: 4, kind: input, shape index: {}]   ;;  %s1247_s5 = inlined_call_operand.vmem [shape: f32[1,128], index: 5, kind: input, shape index: {}]   ;;  %s1248_s6 = inlined_call_operand.<no memory space> [shape: f32[1,1], index: 6, kind: input, shape index: {}]   ;;  %s1249_s7 = inlined_call_operand.hbm [shape: f32[1,128], index: 7, kind: output, shape index: {}]  }
   0x1   :  { %v838_v0 = vld [vmem:[%s1243_s1] sm:$0xff]   ;;  %v30_v2 = vld [vmem:[%s1242_s0 + $0x8] sm:$0xff]  ;;  %v31_v3 = vld [vmem:[%s1242_s0 + $0x10] sm:$0xff] }
   0x2   :  { %v29_v1 = vld [vmem:[%s1242_s0] sm:$0xff]  ;;  %771 = vmatprep.subr.bf16.mxu0 %v838_v0  ;;  %v32_v5 = vld [vmem:[%s1242_s0 + $0x18] sm:$0xff]  ;;  %v34_v7 = vld [vmem:[%s1242_s0 + $0x28] sm:$0xff] }
   0x3   :  { %v45_v4 = vpack.c.bf16 %v30_v2, %v29_v1  ;;  %v33_v6 = vld [vmem:[%s1242_s0 + $0x20] sm:$0xff]  ;;  %772 = vmatpush3.bf16.msra.mxu0 %v838_v0  ;;  %v46_v8 = vpack.c.bf16 %v32_v5, %v31_v3  ;;  %v35_v10 = vld [vmem:[%s1242_s0 + $0x30] sm:$0xff]  ;;  %v36_v11 = vld [vmem:[%s1242_s0 + $0x38] sm:$0xff] }
   0x4   :  { %v47_v9 = vpack.c.bf16 %v34_v7, %v33_v6  ;;  %v37_v12 = vld [vmem:[%s1242_s0 + $0x40] sm:$0xff]  ;;  %v38_v13 = vld [vmem:[%s1242_s0 + $0x48] sm:$0xff]  ;;  %v48_v16 = vpack.c.bf16 %v36_v11, %v35_v10  ;;  %v841_v17 = vld [vmem:[%s1245_s3 + $0x10] sm:$0xff]  }
   0x5   :  { %773 = vmatprep.mubr.msk.bf16.mxu0 %vm68_vm0, %v45_v4  ;;  %v839_v14 = vld [vmem:[%s1245_s3] sm:$0xff]   ;;  %v840_v15 = vld [vmem:[%s1245_s3 + $0x8] sm:$0xff]   ;;  %v49_v18 = vpack.c.bf16 %v38_v13, %v37_v12 }
   0x6   :  { %774 = vmatmul.mubr.msk.bf16.vlgmr.msra.gmra.mrb[0].mxu0 %vm68_vm0, %v46_v8  ;;  %789 = vmatprep.subr.bf16.mxu0 %v839_v14 }
   0x7   :  { %777 = vmatprep.mubr.msk.bf16.mxu0 %vm68_vm0, %v47_v9  ;;  %821 = vmatprep.subr.bf16.mxu1 %v839_v14 }
   0x8   :  { %790 = vmatpush3.bf16.msra.mxu0 %v839_v14  ;;  %829 = vmatpush3.bf16.msra.mxu1 %v839_v14 }
   0x9   :  { %791 = vmatprep.subr.bf16.mxu0 %v840_v15  ;;  %822 = vmatprep.subr.bf16.mxu1 %v840_v15 }
   0xa   :  { %13 = vsyncpa [#allocation4], 0  ;;  %v39_v19 = vld [vmem:[%s1242_s0 + $0x50] sm:$0xff]  ;;  %v40_v20 = vld [vmem:[%s1242_s0 + $0x58] sm:$0xff]  ;;  %vm594_vm1 = vcmask 130112   ;;  %vm601_vm2 = vcmask 195712  }
   0xb   :  { %v41_v21 = vld [vmem:[%s1242_s0 + $0x60] sm:$0xff]  ;;  %v42_v22 = vld [vmem:[%s1242_s0 + $0x68] sm:$0xff]  ;;  %v50_v23 = vpack.c.bf16 %v40_v20, %v39_v19  ;;  %v43_v25 = vld [vmem:[%s1242_s0 + $0x70] sm:$0xff]  ;;  %vm608_vm3 = vcmask 261312   ;;  %vm615_vm4 = vcmask 326912   ;;  %vm622_vm5 = vcmask 392512  }
   0xc   :  { %830 = vmatpush3.bf16.msra.mxu1 %v840_v15  ;;  %792 = vmatpush3.bf16.msra.mxu0 %v840_v15  ;;  %v51_v24 = vpack.c.bf16 %v42_v22, %v41_v21  ;;  %v44_v26 = vld [vmem:[%s1242_s0 + $0x78] sm:$0xff]  ;;  %v843_v29 = vld [vmem:[%s1245_s3 + $0x20] sm:$0xff]   ;;  %v844_v30 = vld [vmem:[%s1245_s3 + $0x28] sm:$0xff]   ;;  %vm629_vm6 = vcmask 458112   ;;  %vm636_vm7 = vcmask 523712   ;;  %vm643_vm8 = vcmask 589312  }
   0xd   :  { %793 = vmatprep.subr.bf16.mxu0 %v841_v17  ;;  %823 = vmatprep.subr.bf16.mxu1 %v841_v17  ;;  %v52_v27 = vpack.c.bf16 %v44_v26, %v43_v25  ;;  %v842_v28 = vld [vmem:[%s1245_s3 + $0x18] sm:$0xff]   ;;  %v845_v31 = vld [vmem:[%s1245_s3 + $0x30] sm:$0xff]   ;;  %v710_v33 = vld [vmem:[%s1244_s2] ss:$0 sm:$0xff]  ;;  %vm650_vm9 = vcmask 654912   ;;  %vm657_vm10 = vcmask 720512  }
   0xe   :  { %778 = vmatmul.mubr.msk.bf16.gmra.mrb[4].mxu0 %vm68_vm0, %v48_v16  ;;  %v846_v32 = vld [vmem:[%s1245_s3 + $0x38] sm:$0xff]   ;;  %v1129_v26 = vld [vmem:[%s1246_s4] ss:$0 sm:$0xff]  ;;  %vm664_vm11 = vcmask 786112   ;;  %vm671_vm12 = vcmask 851712   ;;  %vm678_vm13 = vcmask 917312  }
   0xf   :  { %781 = vmatprep.mubr.msk.bf16.mxu0 %vm68_vm0, %v49_v18  ;;  %vm685_vm14 = vcmask 982912   ;;  %vm692_vm15 = vcmask 1048512  }
  0x10   :  { %831 = vmatpush3.bf16.msra.mxu1 %v841_v17  ;;  %794 = vmatpush3.bf16.msra.mxu0 %v841_v17 }
  0x11   :  { %795 = vmatprep.subr.bf16.mxu0 %v842_v28  ;;  %824 = vmatprep.subr.bf16.mxu1 %v842_v28 }
  0x14   :  { %796 = vmatpush3.bf16.msra.mxu0 %v842_v28  ;;  %832 = vmatpush3.bf16.msra.mxu1 %v842_v28 }
  0x15   :  { %797 = vmatprep.subr.bf16.mxu0 %v843_v29  ;;  %825 = vmatprep.subr.bf16.mxu1 %v843_v29 }
  0x16   :  { %782 = vmatmul.mubr.msk.bf16.gmra.mrb[8].mxu0 %vm68_vm0, %v50_v23 }
  0x17   :  { %785 = vmatprep.mubr.msk.bf16.mxu0 %vm68_vm0, %v51_v24 }
  0x18   :  { %798 = vmatpush3.bf16.msra.mxu0 %v843_v29  ;;  %833 = vmatpush3.bf16.msra.mxu1 %v843_v29 }
  0x19   :  { %799 = vmatprep.subr.bf16.mxu0 %v844_v30  ;;  %826 = vmatprep.subr.bf16.mxu1 %v844_v30 }
  0x1c   :  { %800 = vmatpush3.bf16.msra.mxu0 %v844_v30  ;;  %834 = vmatpush3.bf16.msra.mxu1 %v844_v30 }
  0x1d   :  { %801 = vmatprep.subr.bf16.mxu0 %v845_v31  ;;  %827 = vmatprep.subr.bf16.mxu1 %v845_v31 }
  0x1e   :  { %786 = vmatmul.mubr.msk.bf16.gmra.mrb[12].mxu0 %vm68_vm0, %v52_v27 }
  0x20   :  { %802 = vmatpush3.bf16.msra.mxu0 %v845_v31  ;;  %835 = vmatpush3.bf16.msra.mxu1 %v845_v31 }
  0x21   :  { %803 = vmatprep.subr.bf16.mxu0 %v846_v32  ;;  %828 = vmatprep.subr.bf16.mxu1 %v846_v32 }
  0x24   :  { %804 = vmatpush3.bf16.msra.mxu0 %v846_v32  ;;  %836 = vmatpush3.bf16.msra.mxu1 %v846_v32 }
  0xd9   :  { %v775_v34 = vpop.f32.mrb[0].mxu0 }
  0xda   :  { %v136_v35 = vadd.f32 %v775_v34, %v710_v33  ;;  %v127_v36 = vpop.f32.mrb[1].mxu0 }
  0xdb   :  { %v128_v37 = vadd.f32 %v710_v33, %v127_v36  ;;  %v776_v38 = vpop.f32.mrb[2].mxu0 }
  0xdc   :  { %847 = vtanh.f32 %v136_v35  ;;  %v139_v39 = vadd.f32 %v776_v38, %v710_v33  ;;  %v130_v40 = vpop.f32.mrb[3].mxu0 }
  0xdd   :  { %849 = vtanh.f32 %v128_v37  ;;  %v131_v41 = vadd.f32 %v710_v33, %v130_v40 }
  0xde   :  { %851 = vtanh.f32 %v139_v39 }
  0xdf   :  { %853 = vtanh.f32 %v131_v41 }
  0xe1   :  { %v779_v42 = vpop.f32.mrb[4].mxu0 }
  0xe2   :  { %v152_v43 = vadd.f32 %v779_v42, %v710_v33  ;;  %v143_v44 = vpop.f32.mrb[5].mxu0  ;;  %v1141_v42 = vld [vmem:[%s1247_s5] ss:$0 sm:$0xff] }
  0xe3   :  { %v144_v45 = vadd.f32 %v710_v33, %v143_v44  ;;  %v780_v46 = vpop.f32.mrb[6].mxu0 }
  0xe4   :  { %855 = vtanh.f32 %v152_v43  ;;  %v155_v47 = vadd.f32 %v780_v46, %v710_v33  ;;  %v146_v48 = vpop.f32.mrb[7].mxu0 }
  0xe5   :  { %857 = vtanh.f32 %v144_v45  ;;  %v147_v49 = vadd.f32 %v710_v33, %v146_v48 }
  0xe6   :  { %v848_v50 = vpop.eup %847  ;;  %859 = vtanh.f32 %v155_v47 }
  0xe7   :  { %v850_v51 = vpop.eup %849  ;;  %861 = vtanh.f32 %v147_v49 }
  0xe8   :  { %v852_v52 = vpop.eup %851 }
  0xe9   :  { %v854_v53 = vpop.eup %853  ;;  %v783_v54 = vpop.f32.mrb[8].mxu0  ;;  %v207_v55 = vpack.c.bf16 %v852_v52, %v848_v50 }
  0xea   :  { %v168_v56 = vadd.f32 %v783_v54, %v710_v33  ;;  %v159_v57 = vpop.f32.mrb[9].mxu0  ;;  %v206_v58 = vpack.c.bf16 %v854_v53, %v850_v51 }
  0xeb   :  { %v160_v59 = vadd.f32 %v710_v33, %v159_v57  ;;  %v784_v60 = vpop.f32.mrb[10].mxu0 }
  0xec   :  { %863 = vtanh.f32 %v168_v56  ;;  %v171_v61 = vadd.f32 %v784_v60, %v710_v33  ;;  %v162_v62 = vpop.f32.mrb[11].mxu0  ;;  %805 = vmatprep.mubr.bf16.mxu0 %v206_v58 }
  0xed   :  { %865 = vtanh.f32 %v160_v59  ;;  %v163_v63 = vadd.f32 %v710_v33, %v162_v62  ;;  %806 = vmatmul.mubr.bf16.vlgmr.msra.gmra.mrb[16].mxu0 %v207_v55 }
  0xee   :  { %v856_v0 = vpop.eup %855  ;;  %867 = vtanh.f32 %v171_v61 }
  0xef   :  { %v858_v1 = vpop.eup %857  ;;  %869 = vtanh.f32 %v163_v63 }
  0xf0   :  { %v860_v2 = vpop.eup %859 }
  0xf1   :  { %v862_v3 = vpop.eup %861  ;;  %v787_v4 = vpop.f32.mrb[12].mxu0  ;;  %v209_v5 = vpack.c.bf16 %v860_v2, %v856_v0 }
  0xf2   :  { %v184_v6 = vadd.f32 %v787_v4, %v710_v33  ;;  %v175_v7 = vpop.f32.mrb[13].mxu0  ;;  %v208_v8 = vpack.c.bf16 %v862_v3, %v858_v1 }
  0xf3   :  { %v176_v9 = vadd.f32 %v710_v33, %v175_v7  ;;  %v788_v10 = vpop.f32.mrb[14].mxu0 }
  0xf4   :  { %871 = vtanh.f32 %v184_v6  ;;  %v187_v11 = vadd.f32 %v788_v10, %v710_v33  ;;  %v178_v12 = vpop.f32.mrb[15].mxu0  ;;  %809 = vmatprep.mubr.bf16.mxu1 %v208_v8 }
  0xf5   :  { %873 = vtanh.f32 %v176_v9  ;;  %v179_v13 = vadd.f32 %v710_v33, %v178_v12  ;;  %810 = vmatmul.mubr.bf16.vlgmr.msra.gmra.mrb[0].mxu1 %v209_v5 }
  0xf6   :  { %v864_v14 = vpop.eup %863  ;;  %875 = vtanh.f32 %v187_v11 }
  0xf7   :  { %v866_v15 = vpop.eup %865  ;;  %877 = vtanh.f32 %v179_v13 }
  0xf8   :  { %v868_v16 = vpop.eup %867 }
  0xf9   :  { %v870_v17 = vpop.eup %869  ;;  %v211_v18 = vpack.c.bf16 %v868_v16, %v864_v14 }
  0xfa   :  { %v210_v19 = vpack.c.bf16 %v870_v17, %v866_v15 }
  0xfc   :  { %813 = vmatprep.mubr.bf16.mxu1 %v210_v19 }
  0xfd   :  { %814 = vmatmul.mubr.bf16.gmra.mrb[4].mxu1 %v211_v18 }
  0xfe   :  { %v872_v20 = vpop.eup %871 }
  0xff   :  { %v874_v21 = vpop.eup %873 }
 0x100   :  { %v876_v22 = vpop.eup %875 }
 0x101   :  { %v878_v23 = vpop.eup %877  ;;  %v213_v24 = vpack.c.bf16 %v876_v22, %v872_v20 }
 0x102   :  { %v212_v25 = vpack.c.bf16 %v878_v23, %v874_v21 }
 0x104   :  { %817 = vmatprep.mubr.bf16.mxu1 %v212_v25 }
 0x105   :  { %818 = vmatmul.mubr.bf16.gmra.mrb[8].mxu1 %v213_v24 }
 0x1c0   :  { %v807_v27 = vpop.f32.mrb[16].mxu0 }
 0x1c1   :  { %v328_v28 = vadd.f32 %v807_v27, %v1129_v26  ;;  %v319_v29 = vpop.f32.mrb[17].mxu0 }
 0x1c2   :  { %v320_v30 = vadd.f32 %v1129_v26, %v319_v29  ;;  %v808_v31 = vpop.f32.mrb[18].mxu0 }
 0x1c3   :  { %879 = vtanh.f32 %v328_v28  ;;  %v331_v32 = vadd.f32 %v808_v31, %v1129_v26  ;;  %v322_v33 = vpop.f32.mrb[19].mxu0  ;;  %v1171_v28 = vstv %s1248_s6  ;;  %s999_s6 = smov [#allocation3]  }
 0x1c4   :  { %881 = vtanh.f32 %v320_v30  ;;  %v323_v34 = vadd.f32 %v1129_v26, %v322_v33  ;;  %s702_s29 = sshll.u32 %s999_s6, 4  ;;  %s703_s29 = int_to_ptr.vmem [resolvable:$true] %s702_s29 }
 0x1c5   :  { %883 = vtanh.f32 %v331_v32  ;;  %s975_s30 = scalar_lea.vmem %s703_s29, 16  ;;  %s979_s8 = scalar_lea.vmem %s703_s29, 32 }
 0x1c6   :  { %885 = vtanh.f32 %v323_v34  ;;  %p976_p0 = scmp.ne.s32.totalorder %s703_s29, %s975_s30  ;;  %p980_p1 = scmp.lt.s32.totalorder %s703_s29, %s703_s29 }
 0x1c7   :  { %p981_p2 = scmp.lt.s32.totalorder %s979_s8, %s975_s30 }
 0x1c8   :  { %v811_v35 = vpop.f32.mrb[0].mxu1 }
 0x1c9   :  { %v344_v36 = vadd.f32 %v811_v35, %v1129_v26  ;;  %v335_v37 = vpop.f32.mrb[1].mxu1  ;;  %p982_p3 = por %p981_p2, %p980_p1 }
 0x1ca   :  { %v336_v38 = vadd.f32 %v1129_v26, %v335_v37  ;;  %v812_v39 = vpop.f32.mrb[2].mxu1 }
 0x1cb   :  { %887 = vtanh.f32 %v344_v36  ;;  %v347_v40 = vadd.f32 %v812_v39, %v1129_v26  ;;  %v338_v41 = vpop.f32.mrb[3].mxu1  ;;  %p983_p4 = pnand %p982_p3, %p976_p0 }
 0x1cc   :  { %v339_v43 = vadd.f32 %v1129_v26, %v338_v41 }
 0x1cd   :  { %v880_v44 = vpop.eup %879  ;;  %889 = vtanh.f32 %v347_v40 }
 0x1ce   :  { %v882_v45 = vpop.eup %881  ;;  %891 = vtanh.f32 %v336_v38  ;;  %v408_v46 = vmul.f32 %v880_v44, %v1141_v42 }
 0x1cf   :  { %v884_v47 = vpop.eup %883  ;;  %893 = vtanh.f32 %v339_v43  ;;  %v406_v48 = vmul.f32 %v882_v45, %v1141_v42 }
 0x1d0   :  { %v886_v49 = vpop.eup %885  ;;  %v815_v50 = vpop.f32.mrb[4].mxu1  ;;  %426 = vadd.xlane.f32.xlu1 %v408_v46  ;;  %v409_v55 = vmul.f32 %v884_v47, %v1141_v42 }
 0x1d1   :  { %v360_v51 = vadd.f32 %v815_v50, %v1129_v26  ;;  %v351_v52 = vpop.f32.mrb[5].mxu1  ;;  %422 = vadd.xlane.f32.xlu0 %v406_v48  ;;  %v407_v58 = vmul.f32 %v886_v49, %v1141_v42 }
 0x1d2   :  { %v352_v53 = vadd.f32 %v1129_v26, %v351_v52  ;;  %v816_v54 = vpop.f32.mrb[6].mxu1 }
 0x1d3   :  { %895 = vtanh.f32 %v360_v51  ;;  %v363_v56 = vadd.f32 %v816_v54, %v1129_v26  ;;  %v354_v57 = vpop.f32.mrb[7].mxu1 }
 0x1d4   :  { %v355_v59 = vadd.f32 %v1129_v26, %v354_v57  ;;  %428 = vadd.xlane.f32.xlu1 %v409_v55 }
 0x1d5   :  { %v888_v60 = vpop.eup %887  ;;  %897 = vtanh.f32 %v363_v56  ;;  %424 = vadd.xlane.f32.xlu0 %v407_v58 }
 0x1d6   :  { %899 = vtanh.f32 %v352_v53  ;;  %v412_v61 = vmul.f32 %v888_v60, %v1141_v42 }
 0x1d7   :  { %v890_v62 = vpop.eup %889  ;;  %901 = vtanh.f32 %v355_v59 }
 0x1d8   :  { %v892_v63 = vpop.eup %891  ;;  %v819_v0 = vpop.f32.mrb[8].mxu1  ;;  %v413_v1 = vmul.f32 %v890_v62, %v1141_v42 }
 0x1d9   :  { %v894_v2 = vpop.eup %893  ;;  %v376_v3 = vadd.f32 %v819_v0, %v1129_v26  ;;  %v367_v4 = vpop.f32.mrb[9].mxu1  ;;  %434 = vadd.xlane.f32.xlu0 %v412_v61  ;;  %v410_v8 = vmul.f32 %v892_v63, %v1141_v42  ;;  %v583_v0 = vlaneseq }
 0x1da   :  { %v368_v5 = vadd.f32 %v1129_v26, %v367_v4  ;;  %v820_v6 = vpop.f32.mrb[10].mxu1  ;;  %436 = vadd.xlane.f32.xlu1 %v413_v1  ;;  %v411_v11 = vmul.f32 %v894_v2, %v1141_v42 }
 0x1db   :  { %v370_v7 = vpop.f32.mrb[11].mxu1  ;;  %v379_v9 = vadd.f32 %v820_v6, %v1129_v26 }
 0x1dc   :  { %903 = vtanh.f32 %v368_v5  ;;  %v371_v10 = vadd.f32 %v1129_v26, %v370_v7 }
 0x1dd   :  { %v896_v12 = vpop.eup %895  ;;  %905 = vtanh.f32 %v376_v3  ;;  %430 = vadd.xlane.f32.xlu0 %v410_v8 }
 0x1de   :  { %907 = vtanh.f32 %v371_v10  ;;  %432 = vadd.xlane.f32.xlu1 %v411_v11  ;;  %v416_v13 = vmul.f32 %v896_v12, %v1141_v42  ;;  %v1185_v11 = vand.u32 127, %v583_v0 }
 0x1df   :  { %v898_v14 = vpop.eup %897  ;;  %909 = vtanh.f32 %v379_v9 }
 0x1e0   :  { %v900_v15 = vpop.eup %899  ;;  %v417_v16 = vmul.f32 %v898_v14, %v1141_v42 }
 0x1e1   :  { %v902_v17 = vpop.eup %901  ;;  %442 = vadd.xlane.f32.xlu0 %v416_v13  ;;  %v414_v18 = vmul.f32 %v900_v15, %v1141_v42 }
 0x1e2   :  { %444 = vadd.xlane.f32.xlu1 %v417_v16  ;;  %v415_v19 = vmul.f32 %v902_v17, %v1141_v42  ;;  %v589_v16 = vadd.s32 4294967288, %v1185_v11 }
 0x1e5   :  { %438 = vadd.xlane.f32.xlu0 %v414_v18 }
 0x1e6   :  { %v904_v20 = vpop.eup %903  ;;  %440 = vadd.xlane.f32.xlu1 %v415_v19 }
 0x1e7   :  { %v906_v21 = vpop.eup %905  ;;  %v418_v22 = vmul.f32 %v904_v20, %v1141_v42 }
 0x1e8   :  { %v908_v23 = vpop.eup %907  ;;  %v420_v26 = vmul.f32 %v906_v21, %v1141_v42 }
 0x1e9   :  { %446 = vadd.xlane.f32.xlu0 %v418_v22  ;;  %v419_v24 = vmul.f32 %v908_v23, %v1141_v42  ;;  %v910_v25 = vpop.eup %909  ;;  %v1190_v22 = vshrl.u32 %v583_v0, 7 }
 0x1ea   :  { %v421_v27 = vmul.f32 %v910_v25, %v1141_v42  ;;  %v596_v25 = vadd.s32 4294967280, %v1185_v11 }
 0x1eb   :  { %448 = vadd.xlane.f32.xlu1 %v419_v24 }
 0x1ed   :  { %450 = vadd.xlane.f32.xlu0 %v420_v26 }
 0x1ef   :  { %452 = vadd.xlane.f32.xlu1 %v421_v27 }
 0x25d   :  { %v427_v29 = vpop.xlane.xlu1 %426 }
 0x25e   :  { %v457_v30 = vadd.f32 %v1171_v28, %v427_v29  ;;  %v423_v31 = vpop.xlane.xlu0 %422 }
 0x25f   :  { %v455_v32 = vadd.f32 %v1171_v28, %v423_v31 }
 0x260   :  { %v732_v33 = vmul.f32 -1.442695, %v457_v30  ;;  %v592_v30 = vsub.s32 %v589_v16, %v1190_v22 }
 0x261   :  { %v730_v34 = vmul.f32 -1.442695, %v455_v32  ;;  %v429_v35 = vpop.xlane.xlu1 %428 }
 0x262   :  { %911 = vpow2.f32 %v732_v33  ;;  %v458_v36 = vadd.f32 %v1171_v28, %v429_v35  ;;  %v425_v37 = vpop.xlane.xlu0 %424 }
 0x263   :  { %913 = vpow2.f32 %v730_v34  ;;  %v456_v38 = vadd.f32 %v1171_v28, %v425_v37 }
 0x264   :  { %v733_v39 = vmul.f32 -1.442695, %v458_v36 }
 0x265   :  { %v731_v40 = vmul.f32 -1.442695, %v456_v38  ;;  %v587_v38 = vsub.s32 %v1185_v11, %v1190_v22 }
 0x266   :  { %915 = vpow2.f32 %v733_v39  ;;  %v435_v41 = vpop.xlane.xlu0 %434 }
 0x267   :  { %917 = vpow2.f32 %v731_v40  ;;  %v461_v42 = vadd.f32 %v1171_v28, %v435_v41  ;;  %v437_v43 = vpop.xlane.xlu1 %436  ;;  %v599_v40 = vsub.s32 %v596_v25, %v1190_v22  ;;  %v603_v41 = vadd.s32 4294967272, %v1185_v11 }
 0x268   :  { %v462_v44 = vadd.f32 %v1171_v28, %v437_v43 }
 0x269   :  { %v736_v45 = vmul.f32 -1.442695, %v461_v42 }
 0x26a   :  { %v737_v46 = vmul.f32 -1.442695, %v462_v44  ;;  %v431_v47 = vpop.xlane.xlu0 %430 }
 0x26b   :  { %919 = vpow2.f32 %v736_v45  ;;  %v459_v48 = vadd.f32 %v1171_v28, %v431_v47  ;;  %v433_v49 = vpop.xlane.xlu1 %432  ;;  %v624_v45 = vadd.s32 4294967248, %v1185_v11  ;;  %v610_v47 = vadd.s32 4294967264, %v1185_v11 }
 0x26c   :  { %v912_v50 = vpop.eup %911  ;;  %921 = vpow2.f32 %v737_v46  ;;  %v460_v51 = vadd.f32 %v1171_v28, %v433_v49  ;;  %v1202_v46 = vadd.s32 4294967240, %v1185_v11 }
 0x26d   :  { %v914_v52 = vpop.eup %913  ;;  %v521_v53 = vadd.f32 1.0, %v912_v50  ;;  %v734_v54 = vmul.f32 -1.442695, %v459_v48 }
 0x26e   :  { %v735_v55 = vmul.f32 -1.442695, %v460_v51  ;;  %v443_v56 = vpop.xlane.xlu0 %442  ;;  %v519_v57 = vadd.f32 1.0, %v914_v52  ;;  %v617_v51 = vadd.s32 4294967256, %v1185_v11 }
 0x26f   :  { %v465_v58 = vadd.f32 %v1171_v28, %v443_v56  ;;  %v445_v59 = vpop.xlane.xlu1 %444  ;;  %923 = vrcp.f32 %v521_v53 }
 0x270   :  { %v916_v60 = vpop.eup %915  ;;  %v466_v61 = vadd.f32 %v1171_v28, %v445_v59  ;;  %925 = vpow2.f32 %v734_v54  ;;  %v634_v59 = vsub.s32 %v1202_v46, %v1190_v22 }
 0x271   :  { %v918_v62 = vpop.eup %917  ;;  %v740_v63 = vmul.f32 -1.442695, %v465_v58  ;;  %927 = vpow2.f32 %v735_v55  ;;  %v522_v6 = vadd.f32 1.0, %v916_v60  ;;  %v606_v55 = vsub.s32 %v603_v41, %v1190_v22 }
 0x272   :  { %v520_v1 = vadd.f32 1.0, %v918_v62  ;;  %v741_v2 = vmul.f32 -1.442695, %v466_v61  ;;  %v439_v3 = vpop.xlane.xlu0 %438  ;;  %929 = vrcp.f32 %v519_v57  ;;  %v627_v58 = vsub.s32 %v624_v45, %v1190_v22 }
 0x273   :  { %v463_v4 = vadd.f32 %v1171_v28, %v439_v3  ;;  %v441_v5 = vpop.xlane.xlu1 %440  ;;  %v613_v62 = vsub.s32 %v610_v47, %v1190_v22 }
 0x274   :  { %931 = vrcp.f32 %v520_v1  ;;  %v464_v7 = vadd.f32 %v1171_v28, %v441_v5  ;;  %v620_v1 = vsub.s32 %v617_v51, %v1190_v22 }
 0x275   :  { %v920_v8 = vpop.eup %919  ;;  %933 = vpow2.f32 %v740_v63  ;;  %v738_v9 = vmul.f32 -1.442695, %v463_v4 }
 0x276   :  { %v922_v10 = vpop.eup %921  ;;  %v525_v12 = vadd.f32 1.0, %v920_v8  ;;  %935 = vpow2.f32 %v741_v2  ;;  %v739_v13 = vmul.f32 -1.442695, %v464_v7  ;;  %v447_v14 = vpop.xlane.xlu0 %446  ;;  %v638_v2 = vadd.s32 4294967232, %v1185_v11 }
 0x277   :  { %937 = vpow2.f32 %v738_v9  ;;  %v467_v15 = vadd.f32 %v1171_v28, %v447_v14  ;;  %v526_v17 = vadd.f32 1.0, %v922_v10  ;;  %v652_v8 = vadd.s32 4294967216, %v1185_v11 }
 0x278   :  { %939 = vrcp.f32 %v522_v6  ;;  %v449_v18 = vpop.xlane.xlu1 %448 }
 0x279   :  { %941 = vrcp.f32 %v525_v12  ;;  %v742_v19 = vmul.f32 -1.442695, %v467_v15  ;;  %v468_v20 = vadd.f32 %v1171_v28, %v449_v18  ;;  %v924_v21 = vpop.eup %923 }
 0x27a   :  { %943 = vpow2.f32 %v739_v13  ;;  %v451_v23 = vpop.xlane.xlu0 %450  ;;  %v926_v24 = vpop.eup %925  ;;  %v600_v61 = vrot.slane %v924_v21, %v599_v40  ;;  %v645_v13 = vadd.s32 4294967224, %v1185_v11  ;;  %v680_v40 = vadd.s32 4294967184, %v1185_v11 }
 0x27b   :  { %945 = vpow2.f32 %v742_v19  ;;  %v743_v26 = vmul.f32 -1.442695, %v468_v20  ;;  %v469_v27 = vadd.f32 %v1171_v28, %v451_v23  ;;  %v928_v29 = vpop.eup %927  ;;  %v523_v31 = vadd.f32 1.0, %v926_v24 }
 0x27c   :  { %947 = vrcp.f32 %v526_v17  ;;  %v453_v32 = vpop.xlane.xlu1 %452  ;;  %v930_v33 = vpop.eup %929  ;;  %v524_v34 = vadd.f32 1.0, %v928_v29  ;;  %v641_v17 = vsub.s32 %v638_v2, %v1190_v22  ;;  %v666_v23 = vadd.s32 4294967200, %v1185_v11 }
 0x27d   :  { %949 = vpow2.f32 %v743_v26  ;;  %v744_v35 = vmul.f32 -1.442695, %v469_v27  ;;  %v470_v36 = vadd.f32 %v1171_v28, %v453_v32  ;;  %v588_v50 = vrot.slane %v930_v33, %v587_v38 }
 0x27e   :  { %v932_v37 = vpop.eup %931  ;;  %951 = vrcp.f32 %v523_v31  ;;  %v659_v26 = vadd.s32 4294967208, %v1185_v11  ;;  %v673_v29 = vadd.s32 4294967192, %v1185_v11  ;;  %v648_v32 = vsub.s32 %v645_v13, %v1190_v22 }
 0x27f   :  { %v934_v39 = vpop.eup %933  ;;  %953 = vrcp.f32 %v524_v34  ;;  %v745_v42 = vmul.f32 -1.442695, %v470_v36  ;;  %v593_v44 = vrot.slane %v932_v37, %v592_v30  ;;  %v655_v34 = vsub.s32 %v652_v8, %v1190_v22 }
 0x280   :  { %v936_v43 = vpop.eup %935  ;;  %955 = vpow2.f32 %v744_v35  ;;  %v529_v48 = vadd.f32 1.0, %v934_v39  ;;  %v669_v36 = vsub.s32 %v666_v23, %v1190_v22  ;;  %v662_v39 = vsub.s32 %v659_v26, %v1190_v22 }
 0x281   :  { %v938_v28 = vpop.eup %937  ;;  %957 = vpow2.f32 %v745_v42  ;;  %v530_v52 = vadd.f32 1.0, %v936_v43  ;;  %v595_v57 = vsel %vm594_vm1, %v593_v44, %v588_v50  ;;  %v676_v43 = vsub.s32 %v673_v29, %v1190_v22 }
 0x282   :  { %v940_v49 = vpop.eup %939  ;;  %v527_v53 = vadd.f32 1.0, %v938_v28  ;;  %v602_v5 = vsel %vm601_vm2, %v600_v61, %v595_v57  ;;  %v687_v44 = vadd.s32 4294967176, %v1185_v11  ;;  %v683_v51 = vsub.s32 %v680_v40, %v1190_v22 }
 0x283   :  { %v942_v54 = vpop.eup %941  ;;  %v607_v7 = vrot.slane %v940_v49, %v606_v55 }
 0x284   :  { %v944_v56 = vpop.eup %943  ;;  %959 = vrcp.f32 %v527_v53  ;;  %v628_v19 = vrot.slane %v942_v54, %v627_v58  ;;  %v690_v54 = vsub.s32 %v687_v44, %v1190_v22 }
 0x285   :  { %v946_v60 = vpop.eup %945  ;;  %961 = vrcp.f32 %v529_v48  ;;  %v528_v63 = vadd.f32 1.0, %v944_v56  ;;  %v609_v15 = vsel %vm608_vm3, %v607_v7, %v602_v5 }
 0x286   :  { %v948_v0 = vpop.eup %947  ;;  %963 = vrcp.f32 %v530_v52  ;;  %v531_v3 = vadd.f32 1.0, %v946_v60 }
 0x287   :  { %v950_v4 = vpop.eup %949  ;;  %965 = vrcp.f32 %v528_v63  ;;  %v635_v31 = vrot.slane %v948_v0, %v634_v59 }
 0x288   :  { %v952_v6 = vpop.eup %951  ;;  %967 = vrcp.f32 %v531_v3  ;;  %v532_v9 = vadd.f32 1.0, %v950_v4 }
 0x289   :  { %v954_v10 = vpop.eup %953  ;;  %v614_v12 = vrot.slane %v952_v6, %v613_v62 }
 0x28a   :  { %v956_v14 = vpop.eup %955  ;;  %v621_v16 = vrot.slane %v954_v10, %v620_v1  ;;  %969 = vrcp.f32 %v532_v9 }
 0x28b   :  { %v958_v18 = vpop.eup %957  ;;  %v616_v20 = vsel %vm615_vm4, %v614_v12, %v609_v15  ;;  %v533_v21 = vadd.f32 1.0, %v956_v14 }
 0x28c   :  { %v623_v24 = vsel %vm622_vm5, %v621_v16, %v616_v20  ;;  %v534_v25 = vadd.f32 1.0, %v958_v18 }
 0x28d   :  { %971 = vrcp.f32 %v533_v21  ;;  %v630_v27 = vsel %vm629_vm6, %v628_v19, %v623_v24 }
 0x28e   :  { %v960_v30 = vpop.eup %959  ;;  %973 = vrcp.f32 %v534_v25  ;;  %v637_v38 = vsel %vm636_vm7, %v635_v31, %v630_v27 }
 0x28f   :  { %v962_v33 = vpop.eup %961  ;;  %v642_v35 = vrot.slane %v960_v30, %v641_v17 }
 0x290   :  { %v964_v37 = vpop.eup %963  ;;  %v656_v28 = vrot.slane %v962_v33, %v655_v34 }
 0x291   :  { %v966_v41 = vpop.eup %965  ;;  %v644_v42 = vsel %vm643_vm8, %v642_v35, %v637_v38  ;;  %v663_v50 = vrot.slane %v964_v37, %v662_v39 }
 0x292   :  { %v968_v45 = vpop.eup %967  ;;  %v649_v46 = vrot.slane %v966_v41, %v648_v32 }
 0x293   :  { %v670_v47 = vrot.slane %v968_v45, %v669_v36 }
 0x294   :  { %v970_v48 = vpop.eup %969  ;;  %v651_v49 = vsel %vm650_vm9, %v649_v46, %v644_v42 }
 0x295   :  { %v658_v52 = vsel %vm657_vm10, %v656_v28, %v651_v49  ;;  %v677_v53 = vrot.slane %v970_v48, %v676_v43 }
 0x296   :  { %v665_v55 = vsel %vm664_vm11, %v663_v50, %v658_v52 }
 0x297   :  { %v972_v56 = vpop.eup %971  ;;  %v672_v11 = vsel %vm671_vm12, %v670_v47, %v665_v55 }
 0x298   :  { %v974_v57 = vpop.eup %973  ;;  %v679_v58 = vsel %vm678_vm13, %v677_v53, %v672_v11  ;;  %v684_v59 = vrot.slane %v972_v56, %v683_v51 }
 0x299   :  { %v691_v60 = vrot.slane %v974_v57, %v690_v54 }
 0x29a   :  { %v686_v61 = vsel %vm685_vm14, %v684_v59, %v679_v58 }
 0x29b   :  { %v693_v62 = vsel %vm692_vm15, %v691_v60, %v686_v61 }
 0x29c   :  { %695 = vst [vmem:[#allocation3] sm:$0x1] %v693_v62 }
 0x29d   :  { %986 = shalt.err (!%p983_p4)
}
 0x29e   :  { %s987_s1 = scalar_lea.hbm %s1249_s7, 16 }
 0x29f   :  { %p988_p5 = scmp.ne.s32.totalorder %s1249_s7, %s987_s1  ;;  %p991_p6 = scmp.lt.u32.totalorder %s987_s1, %s1249_s7 }
 0x2a1   :  { %p993_p7 = pnand %p991_p6, %p988_p5 }
 0x2a3   :  { %996 = shalt.err (!%p993_p7)
}
 0x2a4   :  { %705 = dma.vmem_to_hbm [thread:$0]  %s703_s29, 16, %s1249_s7, [#allocation4]  }
 0x2a5   :  { %997 = dma.done.wait [#allocation4], 16  }
 0x2a6   :  { %998 = vsyncadd [#allocation4], 4294967280 }
 0x2a7   :  { %709 = vsyncpa [#allocation4], 1 }

</bundles_post_ra>
